<compile_context>
chip_gen: v7x
topology: tpu7x:2x2x1
jax: 0.10.0
libtpu: 0.0.40
codegen_flags: <defaults>
</compile_context>

<pallas_src>
import jax
import jax.numpy as jnp
from jax.experimental import pallas as pl
from jax.experimental.pallas import tpu as pltpu


def mediator_kernel(x_ref, w1_ref, w2_ref, w3_ref, bias_ref, o_ref):
    # Batch-on-lanes: x tile is [F, tb]; intermediates are [H, tb]; output is
    # [1, tb] (lane-dense).
    x = x_ref[...]                       # [F, tb] (f32 or bf16)
    bias = bias_ref[...]                 # [H, 3] f32 (single packed slab)
    b1 = bias[:, 0:1]                    # [H, 1]
    b2 = bias[:, 1:2]                    # [H, 1]
    b3 = bias[0:1, 2:3]                  # [1, 1]

    # fc1: Linear(F, 50) + ReLU   -> [H, tb]
    h1 = jnp.dot(w1_ref[...], x, preferred_element_type=jnp.float32) + b1
    h1 = jnp.maximum(h1, 0.0)

    # fc2: Linear(50, 50) + ReLU  -> [H, tb]
    h2 = jnp.dot(w2_ref[...], h1.astype(w2_ref.dtype),
                 preferred_element_type=jnp.float32) + b2
    h2 = jnp.maximum(h2, 0.0)

    # fc3: Linear(50, 1) + Sigmoid -> [1, tb]  (large-N MXU pass, lane-dense)
    z = jnp.dot(w3_ref[...], h2.astype(w3_ref.dtype),
                preferred_element_type=jnp.float32) + b3
    o_ref[...] = jax.nn.sigmoid(z).astype(o_ref.dtype)


def _pick_tb(B):
    # Lane-dense tiles (multiples of 128). Cap at 2048 so double-buffered x
    # tiles + [H, tb] intermediates stay far inside scoped VMEM even on v7x
    # (64 MiB physical). Aim for >= 2 grid steps when B allows so the
    # "parallel" batch axis can shard across v7x's two TensorCores.
    if B <= 256:
        return 128
    half = (B + 1) // 2
    return min(2048, ((half + 127) // 128) * 128)


def mediator_forward(x, params, *, tb=None, use_bf16=False):
    """x: [B, F] float32. params: dict of w1,b1,w2,b2,w3,b3. Returns [B, 1] f32."""
    B, F = x.shape
    H = params["w1"].shape[1]  # 50

    tb = _pick_tb(B) if tb is None else tb
    B_pad = ((B + tb - 1) // tb) * tb

    compute_dtype = jnp.bfloat16 if use_bf16 else jnp.float32

    # Batch-on-lanes layout: x -> [F, B_pad]; weights transposed to [out, in].
    x_t = x.T
    if B_pad != B:
        x_t = jnp.pad(x_t, ((0, 0), (0, B_pad - B)))
    x_t = x_t.astype(compute_dtype)

    w1t = params["w1"].T.astype(compute_dtype)   # [H, F]
    w2t = params["w2"].T.astype(compute_dtype)   # [H, H]
    w3t = params["w3"].T.astype(compute_dtype)   # [1, H]

    # Pack biases into one f32 slab: col 0 = b1, col 1 = b2, [0, 2] = b3.
    bias_pack = jnp.zeros((H, 3), jnp.float32)
    bias_pack = bias_pack.at[:, 0].set(params["b1"].astype(jnp.float32))
    bias_pack = bias_pack.at[:, 1].set(params["b2"].astype(jnp.float32))
    bias_pack = bias_pack.at[0, 2].set(params["b3"].astype(jnp.float32)[0])

    grid = (B_pad // tb,)
    out = pl.pallas_call(
        mediator_kernel,
        out_shape=jax.ShapeDtypeStruct((1, B_pad), jnp.float32),
        grid_spec=pltpu.PrefetchScalarGridSpec(
            num_scalar_prefetch=0,
            grid=grid,
            in_specs=[
                pl.BlockSpec((F, tb), lambda i: (0, i)),   # x tile  [F, tb]
                pl.BlockSpec((H, F), lambda i: (0, 0)),    # w1^T    (grid-invariant)
                pl.BlockSpec((H, H), lambda i: (0, 0)),    # w2^T    (grid-invariant)
                pl.BlockSpec((1, H), lambda i: (0, 0)),    # w3^T    (grid-invariant)
                pl.BlockSpec((H, 3), lambda i: (0, 0)),    # packed biases
            ],
            out_specs=pl.BlockSpec((1, tb), lambda i: (0, i)),  # lane-dense output
        ),
        compiler_params=pltpu.CompilerParams(
            dimension_semantics=("parallel",),
        ),
    )(x_t, w1t, w2t, w3t, bias_pack)

    return out[0, :B].reshape(B, 1)


def init_params(key, feature_num, hidden=50):
    """Deterministic init mimicking PyTorch Linear default (U[-1/sqrt(fan_in), +])."""
    ks = jax.random.split(key, 6)

    def lin(kw, kb, fan_in, fan_out):
        bound = 1.0 / jnp.sqrt(fan_in)
        w = jax.random.uniform(kw, (fan_in, fan_out), jnp.float32, -bound, bound)
        b = jax.random.uniform(kb, (fan_out,), jnp.float32, -bound, bound)
        return w, b

    w1, b1 = lin(ks[0], ks[1], feature_num, hidden)
    w2, b2 = lin(ks[2], ks[3], hidden, hidden)
    w3, b3 = lin(ks[4], ks[5], hidden, 1)
    return {"w1": w1, "b1": b1, "w2": w2, "b2": b2, "w3": w3, "b3": b3}


def mediator_reference(x, p):
    h1 = jnp.maximum(x @ p["w1"] + p["b1"], 0.0)
    h2 = jnp.maximum(h1 @ p["w2"] + p["b2"], 0.0)
    return jax.nn.sigmoid(h2 @ p["w3"] + p["b3"])


if __name__ == "__main__":
    key = jax.random.PRNGKey(0)
    k_x, k_p = jax.random.split(key)

    B, F = 256, 32  # small shapes: batch=256 (2 lane-dense tiles), feature_num=32
    x = jax.random.normal(k_x, (B, F), dtype=jnp.float32)
    params = init_params(k_p, F)

    ref = mediator_reference(x, params)

    # f32 path (exact-ish): tile = 128 lanes, grid = 2.
    out = mediator_forward(x, params)
    out = jax.block_until_ready(out)
    assert out.shape == (B, 1)
    assert jnp.allclose(out, ref, atol=1e-5, rtol=1e-5)

    # bf16 MXU operands, f32 accumulation + f32 epilogue (v6e/v7x HBM saver).
    out_bf16 = mediator_forward(x, params, use_bf16=True)
    out_bf16 = jax.block_until_ready(out_bf16)
    assert out_bf16.shape == (B, 1)
    assert jnp.allclose(out_bf16, ref, atol=5e-2)

    print("KERNEL_OK")
</pallas_src>

<mosaic_0001>
module attributes {stable_mosaic.version = 11 : i64} {
  func.func @mediator_kernel(%arg0: i32, %arg1: memref<32x128xf32, #tpu.memory_space<vmem>>, %arg2: memref<50x32xf32, #tpu.memory_space<vmem>>, %arg3: memref<50x50xf32, #tpu.memory_space<vmem>>, %arg4: memref<1x50xf32, #tpu.memory_space<vmem>>, %arg5: memref<50x3xf32, #tpu.memory_space<vmem>>, %arg6: memref<1x128xf32, #tpu.memory_space<vmem>>) attributes {dimension_semantics = [#tpu.dimension_semantics<parallel>], iteration_bounds = array<i64: 2>, scalar_prefetch = 0 : i64, scratch_operands = 0 : i64, tpu.core_type = #tpu.core_type<tc>, window_params = [{transform_indices = @transform_0, window_bounds = array<i64: 32, 128>}, {pipeline_mode = #tpu.pipeline_mode<synchronous>, transform_indices = @transform_1, window_bounds = array<i64: 50, 32>}, {pipeline_mode = #tpu.pipeline_mode<synchronous>, transform_indices = @transform_2, window_bounds = array<i64: 50, 50>}, {pipeline_mode = #tpu.pipeline_mode<synchronous>, transform_indices = @transform_3, window_bounds = array<i64: 1, 50>}, {pipeline_mode = #tpu.pipeline_mode<synchronous>, transform_indices = @transform_4, window_bounds = array<i64: 50, 3>}, {transform_indices = @transform_5, window_bounds = array<i64: 1, 128>}]} {
    %c0 = arith.constant 0 : index
    %c0_0 = arith.constant 0 : index
    %0 = vector.load %arg1[%c0, %c0_0] : memref<32x128xf32, #tpu.memory_space<vmem>>, vector<32x128xf32>
    %c0_1 = arith.constant 0 : index
    %c0_2 = arith.constant 0 : index
    %1 = vector.load %arg5[%c0_1, %c0_2] : memref<50x3xf32, #tpu.memory_space<vmem>>, vector<50x3xf32>
    %2 = vector.extract_strided_slice %1 {offsets = [0, 0], sizes = [50, 1], strides = [1, 1]} : vector<50x3xf32> to vector<50x1xf32>
    %3 = vector.extract_strided_slice %1 {offsets = [0, 1], sizes = [50, 1], strides = [1, 1]} : vector<50x3xf32> to vector<50x1xf32>
    %4 = vector.extract_strided_slice %1 {offsets = [0, 2], sizes = [1, 1], strides = [1, 1]} : vector<50x3xf32> to vector<1x1xf32>
    %c0_3 = arith.constant 0 : index
    %c0_4 = arith.constant 0 : index
    %5 = vector.load %arg2[%c0_3, %c0_4] : memref<50x32xf32, #tpu.memory_space<vmem>>, vector<50x32xf32>
    %cst = arith.constant dense<0.000000e+00> : vector<50x128xf32>
    %6 = tpu.matmul %5, %0, %cst {dimension_numbers = #tpu.dot_dimension_numbers<[1], [0], [0], [1], [0, 0, 1, 1], [], []>} : vector<50x32xf32>, vector<32x128xf32>, vector<50x128xf32> -> vector<50x128xf32>
    %7 = vector.broadcast %2 : vector<50x1xf32> to vector<50x128xf32>
    %8 = arith.addf %6, %7 : vector<50x128xf32>
    %cst_5 = arith.constant 0.000000e+00 : f32
    %9 = vector.broadcast %cst_5 : f32 to vector<50x128xf32>
    %10 = arith.maximumf %8, %9 : vector<50x128xf32>
    %c0_6 = arith.constant 0 : index
    %c0_7 = arith.constant 0 : index
    %11 = vector.load %arg3[%c0_6, %c0_7] : memref<50x50xf32, #tpu.memory_space<vmem>>, vector<50x50xf32>
    %cst_8 = arith.constant dense<0.000000e+00> : vector<50x128xf32>
    %12 = tpu.matmul %11, %10, %cst_8 {dimension_numbers = #tpu.dot_dimension_numbers<[1], [0], [0], [1], [0, 0, 1, 1], [], []>} : vector<50x50xf32>, vector<50x128xf32>, vector<50x128xf32> -> vector<50x128xf32>
    %13 = vector.broadcast %3 : vector<50x1xf32> to vector<50x128xf32>
    %14 = arith.addf %12, %13 : vector<50x128xf32>
    %cst_9 = arith.constant 0.000000e+00 : f32
    %15 = vector.broadcast %cst_9 : f32 to vector<50x128xf32>
    %16 = arith.maximumf %14, %15 : vector<50x128xf32>
    %c0_10 = arith.constant 0 : index
    %c0_11 = arith.constant 0 : index
    %17 = vector.load %arg4[%c0_10, %c0_11] : memref<1x50xf32, #tpu.memory_space<vmem>>, vector<1x50xf32>
    %cst_12 = arith.constant dense<0.000000e+00> : vector<1x128xf32>
    %18 = tpu.matmul %17, %16, %cst_12 {dimension_numbers = #tpu.dot_dimension_numbers<[1], [0], [0], [1], [0, 0, 1, 1], [], []>} : vector<1x50xf32>, vector<50x128xf32>, vector<1x128xf32> -> vector<1x128xf32>
    %19 = vector.broadcast %4 : vector<1x1xf32> to vector<1x128xf32>
    %20 = arith.addf %18, %19 : vector<1x128xf32>
    %21 = arith.negf %20 : vector<1x128xf32>
    %22 = math.exp %21 : vector<1x128xf32>
    %cst_13 = arith.constant 1.000000e+00 : f32
    %23 = vector.broadcast %cst_13 : f32 to vector<1x128xf32>
    %24 = arith.addf %23, %22 : vector<1x128xf32>
    %25 = arith.divf %23, %24 : vector<1x128xf32>
    %c0_14 = arith.constant 0 : index
    %c0_15 = arith.constant 0 : index
    %26 = vector.load %arg6[%c0_14, %c0_15] : memref<1x128xf32, #tpu.memory_space<vmem>>, vector<1x128xf32>
    tpu.vector_store %arg6[%c0_14, %c0_15], %25 {strides = array<i32>} : memref<1x128xf32, #tpu.memory_space<vmem>>, vector<1x128xf32>,
    return
  }
  func.func @transform_0(%arg0: i32) -> (i32, i32) {
    %c0_i32 = arith.constant 0 : i32
    %c0_i32_0 = arith.constant 0 : i32
    return %c0_i32, %arg0 : i32, i32
  }
  func.func @transform_1(%arg0: i32) -> (i32, i32) {
    %c0_i32 = arith.constant 0 : i32
    %c0_i32_0 = arith.constant 0 : i32
    %c0_i32_1 = arith.constant 0 : i32
    return %c0_i32, %c0_i32_0 : i32, i32
  }
  func.func @transform_2(%arg0: i32) -> (i32, i32) {
    %c0_i32 = arith.constant 0 : i32
    %c0_i32_0 = arith.constant 0 : i32
    %c0_i32_1 = arith.constant 0 : i32
    return %c0_i32, %c0_i32_0 : i32, i32
  }
  func.func @transform_3(%arg0: i32) -> (i32, i32) {
    %c0_i32 = arith.constant 0 : i32
    %c0_i32_0 = arith.constant 0 : i32
    %c0_i32_1 = arith.constant 0 : i32
    return %c0_i32, %c0_i32_0 : i32, i32
  }
  func.func @transform_4(%arg0: i32) -> (i32, i32) {
    %c0_i32 = arith.constant 0 : i32
    %c0_i32_0 = arith.constant 0 : i32
    %c0_i32_1 = arith.constant 0 : i32
    return %c0_i32, %c0_i32_0 : i32, i32
  }
  func.func @transform_5(%arg0: i32) -> (i32, i32) {
    %c0_i32 = arith.constant 0 : i32
    %c0_i32_0 = arith.constant 0 : i32
    return %c0_i32, %arg0 : i32, i32
  }
}

</mosaic_0001>

<bundles_post_ra>
// kernel: tpu_custom_call.1
= control target key start
LH: loop header
LB: loop body
LE: loop exit
PB: predicated region body
PF: predicated region fallthrough
CT: control target
= control target key end

     0   :  { %10 = vsyncpa [#allocation4], 0  ;;  %s1340_s0 = inlined_call_operand.vmem [shape: f32[32,256], index: 0, kind: input, shape index: {}]   ;;  %s1341_s1 = inlined_call_operand.vmem [shape: f32[50,32], index: 1, kind: input, shape index: {}]   ;;  %s1342_s2 = inlined_call_operand.vmem [shape: f32[50,50], index: 2, kind: input, shape index: {}]   ;;  %s1343_s3 = inlined_call_operand.vmem [shape: f32[1,50], index: 3, kind: input, shape index: {}]   ;;  %s1344_s4 = inlined_call_operand.vmem [shape: f32[50,3], index: 4, kind: input, shape index: {}]   ;;  %s1345_s5 = inlined_call_operand.hbm [shape: f32[1,256], index: 5, kind: output, shape index: {}]  }
   0x1   :  { %12 = vsyncpa [#allocation4 + $0x1], 0  ;;  %s1102_s18 = smov 0   ;;  %s1104_s19 = smov 0  }
   0x2   :  { %s1106_s20 = smov 0   ;;  %s1108_s21 = smov 0  }
   0x3 LB: > { %s779_s22 = sadd.s32 4294967295, %s1063_s21   ;;  %s780_s23 = sadd.s32 4294967294, %s1063_s21   ;;  %s1063_s21 = sphi %s1108_s21, %s1351_s21   ;;  %s1059_s20 = sphi %s1106_s20, %s1350_s20   ;;  %s1055_s19 = sphi %s1104_s19, %s1349_s19   ;;  %s1051_s18 = sphi %s1102_s18, %s1348_s18  }
   0x4   : > { %s1125_s24 = sadd.s32 1, %s1063_s21   ;;  %s25_s25 = sadd.s32 1, %s1059_s20 }
   0x5   : > { %s22_s26 = ssub.s32 %s1063_s21, %s1125_s24  ;;  %p32_p0 = scmp.ne.s32.totalorder %s1059_s20, %s1055_s19 }
   0x6   : > { %p23_p1 = scmp.eq.s32.totalorder %s22_s26, 0  ;;  %p33_p2 = scmp.eq.s32.totalorder %s1063_s21, 0 }
   0x7   : > { %p146_p3 = scmp.eq.s32.totalorder %s779_s22, 1  ;;  %p151_p4 = scmp.ne.s32.totalorder %s1055_s19, %s1051_s18 }
   0x8   : > { %s1138_s27 = scalar_select %p23_p1, %s1059_s20, %s25_s25  }
   0x9   : > { %p34_p5 = por %p33_p2, %p32_p0  ;;  %p1140_p6 = por %p146_p3, %p32_p0 }
   0xa   : > { %p152_p7 = scmp.eq.s32.totalorder %s780_s23, 1  ;;  %p782_p9 = scmp.ge.s32.totalorder %s1063_s21, 2 }
   0xc   : > { %p1144_p8 = por %p152_p7, %p151_p4  ;;  %180 = sbr.rel (%p782_p9) target bundleno = 26 (0x1a), region = 32 }
  0x13   : > { %183 = sbr.rel (!%p34_p5) target bundleno = 26 (0x1a), region = 36  ;;  %s185_s30 = sand.u32 (%p34_p5), 1, %s1059_s20  }
  0x14   : > { %s784_s6 = sshll.u32 (%p34_p5), %s1063_s21, 3  ;;  %s783_s7 = sshll.u32 (%p34_p5), %s185_s30, 5 }
  0x15   : > { %s189_s10 = scalar_lea.vmem (%p34_p5), %s1340_s0, %s784_s6  ;;  %s187_s11 = scalar_lea.vmem (%p34_p5), [#allocation2], %s783_s7 }
  0x16   : > { %v223_v0 = vld [vmem:[%s189_s10] sm:$0xff] (%p34_p5)  ;;  %v225_v1 = vld [vmem:[%s189_s10 + $0x10] sm:$0xff] (%p34_p5) }
  0x17   : > { %v227_v2 = vld [vmem:[%s189_s10 + $0x20] sm:$0xff] (%p34_p5)  ;;  %224 = vst [vmem:[%s187_s11] sm:$0xff] (%p34_p5), %v223_v0  ;;  %226 = vst [vmem:[%s187_s11 + $0x8] sm:$0xff] (%p34_p5), %v225_v1  ;;  %v229_v3 = vld [vmem:[%s189_s10 + $0x30] sm:$0xff] (%p34_p5) }
  0x18   : > { %228 = vst [vmem:[%s187_s11 + $0x10] sm:$0xff] (%p34_p5), %v227_v2  ;;  %230 = vst [vmem:[%s187_s11 + $0x18] sm:$0xff] (%p34_p5), %v229_v3 }
  0x1a PF: > { %p785_p10 = scmp.ge.s32.totalorder %s1063_s21, 1  ;;  %p235_p11 = scmp.lt.s32.totalorder %s1063_s21, 3 }
  0x1c   : > { %p236_p12 = pnand %p785_p10, %p235_p11 }
  0x1d   : > { %s1159_s12 = sand.u32 (!%p236_p12), 1, %s1055_s19   ;;  %v1065_v4 = vmov (!%p236_p12), 0.0|0.0   ;;  %vm1066_vm0 = vmmov (!%p236_p12), 0   ;;  %v1067_v5 = vmov (!%p236_p12), 0.0   ;;  %v1068_v6 = vmov (!%p236_p12), 0   ;;  %v1171_v12 = vld [vmem:[%s1344_s4] sm:$0xff] (!%p236_p12) }
  0x1e   : > { %239 = sbr.rel (%p236_p12) target bundleno = 782 (0x30e), region = 74  ;;  %922 = vmatprep.subr.bf16.mxu0 (!%p236_p12), %v1065_v4  ;;  %s786_s13 = sshll.u32 (!%p236_p12), %s1159_s12, 5  ;;  %849 = vmatprep.mubr.msk.f32.mxu0 (!%p236_p12), %vm1066_vm0, %v1067_v5  ;;  %v274_v13 = vld [vmem:[%s1344_s4 + $0x10] sm:$0xff] (!%p236_p12)  ;;  %v273_v15 = vld [vmem:[%s1344_s4 + $0x8] sm:$0xff] (!%p236_p12)  ;;  %v275_v16 = vld [vmem:[%s1344_s4 + $0x18] sm:$0xff] (!%p236_p12)  ;;  %vm321_vm1 = vcmask (!%p236_p12), 261120  }
  0x1f   : > { %991 = vset.pattern.permute.xlu0 (!%p236_p12), %v1068_v6  ;;  %992 = vset.pattern.permute.xlu1 (!%p236_p12), %v1068_v6  ;;  %s244_s14 = scalar_lea.vmem (!%p236_p12), [#allocation2], %s786_s13  ;;  %v279_v17 = vld [vmem:[%s1341_s1] sm:$0xff] (!%p236_p12)  ;;  %v277_v19 = vld [vmem:[%s1344_s4 + $0x28] sm:$0xff] (!%p236_p12)  ;;  %v278_v21 = vld [vmem:[%s1344_s4 + $0x30] sm:$0x3] (!%p236_p12)  ;;  %v1069_v27 = vmov (!%p236_p12), 1  }
  0x20   : > { %v268_v7 = vld [vmem:[%s244_s14] sm:$0xff] (!%p236_p12)  ;;  %v269_v8 = vld [vmem:[%s244_s14 + $0x8] sm:$0xff] (!%p236_p12)  ;;  %v270_v9 = vld [vmem:[%s244_s14 + $0x10] sm:$0xff] (!%p236_p12)  ;;  %928 = vmatprep.subr.bf16.mxu1 (!%p236_p12), %v1065_v4  ;;  %884 = vmatprep.mubr.msk.f32.mxu1 (!%p236_p12), %vm1066_vm0, %v1067_v5  ;;  %vm507_vm2 = vcmask (!%p236_p12), 1041408   ;;  %vm485_vm3 = vcmask (!%p236_p12), 408576   ;;  %s267_s15 = scalar_lea.vmem (!%p236_p12), [#allocation3], %s1159_s12 }
  0x21   : > { %v923_v10 = vpack.c.bf16 (!%p236_p12), %v269_v8, %v268_v7  ;;  %v271_v11 = vld [vmem:[%s244_s14 + $0x18] sm:$0xff] (!%p236_p12)  ;;  %288 = vperm.xlu0 (!%p236_p12), %991, %v1171_v12   ;;  %298 = vperm.xlu1 (!%p236_p12), %992, %v274_v13   ;;  %v276_v18 = vld [vmem:[%s1344_s4 + $0x20] sm:$0xff] (!%p236_p12)  ;;  %v280_v20 = vld [vmem:[%s1341_s1 + $0x8] sm:$0xff] (!%p236_p12)  ;;  %s805_s14 = sshll.u32 (!%p236_p12), %s779_s22, 4  ;;  %s719_s16 = sshll.u32 (!%p236_p12), %s267_s15, 4  ;;  %s1298_s16 = int_to_ptr.vmem [resolvable:$true] %s719_s16 }
  0x22   : > { %v926_v14 = vpack.c.bf16 (!%p236_p12), %v271_v11, %v270_v9  ;;  %v281_v22 = vld [vmem:[%s1341_s1 + $0x10] sm:$0xff] (!%p236_p12)  ;;  %v282_v23 = vld [vmem:[%s1341_s1 + $0x18] sm:$0xff] (!%p236_p12)  ;;  %v283_v24 = vld [vmem:[%s1341_s1 + $0x20] sm:$0xff] (!%p236_p12)  ;;  %v1070_v11 = vmov (!%p236_p12), 2   ;;  %s1296_s25 = scalar_lea.hbm (!%p236_p12), %s1345_s5, %s805_s14  ;;  %s707_s26 = scalar_lea.sflag (!%p236_p12), [#allocation4], %s1159_s12 }
  0x23   : > { %924 = vmatpush3.bf16.msra.mxu0 (!%p236_p12), %v923_v10  ;;  %v284_v25 = vld [vmem:[%s1341_s1 + $0x28] sm:$0xff] (!%p236_p12)  ;;  %v285_v26 = vld [vmem:[%s1341_s1 + $0x30] sm:$0x3] (!%p236_p12)  ;;  %v450_v2 = vld [vmem:[%s1342_s2] sm:$0xff] (!%p236_p12)  ;;  %s1001_s30 = scalar_lea.vmem (!%p236_p12), %s1298_s16, 16  ;;  %s1071_s22 = smov (!%p236_p12), [#allocation3]  }
  0x24   : > { %925 = vmatprep.subr.bf16.mxu0 (!%p236_p12), %v1065_v4  ;;  %v451_v3 = vld [vmem:[%s1342_s2 + $0x8] sm:$0xff] (!%p236_p12)  ;;  %v452_v6 = vld [vmem:[%s1342_s2 + $0x10] sm:$0xff] (!%p236_p12)  ;;  %v453_v7 = vld [vmem:[%s1342_s2 + $0x18] sm:$0xff] (!%p236_p12)  ;;  %p1002_p13 = scmp.ne.s32.totalorder (!%p236_p12), %s1298_s16, %s1001_s30  ;;  %s1005_s6 = sshll.u32 (!%p236_p12), %s1071_s22, 4  ;;  %s1006_s6 = int_to_ptr.vmem [resolvable:$false] %s1005_s6 }
  0x25   : > { %293 = vperm.xlu0 %991, %v273_v15   ;;  %303 = vperm.xlu1 %992, %v275_v16   ;;  %v454_v8 = vld [vmem:[%s1342_s2 + $0x20] sm:$0xff]  ;;  %v455_v9 = vld [vmem:[%s1342_s2 + $0x28] sm:$0xff]  ;;  %v456_v10 = vld [vmem:[%s1342_s2 + $0x30] sm:$0x3]  ;;  %s1007_s7 = scalar_lea.vmem %s1006_s6, 32  ;;  %p1008_p2 = scmp.lt.s32.totalorder %s1298_s16, %s1006_s6 }
  0x26   : > { %p1003_p0 = pnand %p1002_p13, %p1140_p6  ;;  %p1009_p3 = scmp.lt.s32.totalorder %s1007_s7, %s1001_s30 }
  0x27   : > { %927 = vmatpush3.bf16.msra.mxu0 %v926_v14 }
  0x28   : > { %937 = vmatprep.subr.bf16.mxu0 %v1065_v4  ;;  %p1004_p1 = pneg %p1003_p0  ;;  %p1010_p4 = por %p1009_p3, %p1008_p2 }
  0x29   : > { %308 = vperm.xlu0 %991, %v276_v18   ;;  %313 = vperm.xlu1 %992, %v277_v19  }
  0x2a   : > { %850 = vmatmul.mubr.msk.f32.vlgmr.msra.gmra.mrb[0].mxu0 %vm321_vm1, %v279_v17  ;;  %p1011_p5 = pnand %p1010_p4, %p1004_p1 }
  0x2b   : > { %852 = vmatprep.mubr.msk.f32.mxu0 %vm1066_vm0, %v1067_v5 }
  0x2d   : > { %318 = vperm.xlu0 %991, %v278_v21   ;;  %993 = vset.pattern.permute.xlu1 %v1069_v27 }
  0x2e   : > { %853 = vmatmul.mubr.msk.f32.gmra.mrb[2].mxu0 %vm321_vm1, %v280_v20  ;;  %458 = vperm.xlu1 %993, %v1171_v12  }
  0x2f   : > { %855 = vmatprep.mubr.msk.f32.mxu0 %vm1066_vm0, %v1067_v5 }
  0x31   : > { %994 = vset.pattern.permute.xlu0 %v1069_v27 }
  0x32   : > { %856 = vmatmul.mubr.msk.f32.gmra.mrb[4].mxu0 %vm321_vm1, %v281_v22  ;;  %462 = vperm.xlu0 %994, %v273_v15  }
  0x33   : > { %858 = vmatprep.mubr.msk.f32.mxu0 %vm1066_vm0, %v1067_v5  ;;  %466 = vperm.xlu1 %993, %v274_v13  }
  0x36   : > { %859 = vmatmul.mubr.msk.f32.gmra.mrb[6].mxu0 %vm321_vm1, %v282_v23  ;;  %474 = vperm.xlu0 %994, %v276_v18  }
  0x37   : > { %861 = vmatprep.mubr.msk.f32.mxu0 %vm1066_vm0, %v1067_v5  ;;  %470 = vperm.xlu1 %993, %v275_v16  }
  0x3a   : > { %862 = vmatmul.mubr.msk.f32.gmra.mrb[8].mxu0 %vm321_vm1, %v283_v24  ;;  %482 = vperm.xlu0 %994, %v278_v21  }
  0x3b   : > { %864 = vmatprep.mubr.msk.f32.mxu0 %vm1066_vm0, %v1067_v5  ;;  %478 = vperm.xlu1 %993, %v277_v19  }
  0x3e   : > { %865 = vmatmul.mubr.msk.f32.gmra.mrb[10].mxu0 %vm321_vm1, %v284_v25  ;;  %996 = vset.pattern.permute.xlu0 %v1070_v11 }
  0x3f   : > { %867 = vmatprep.mubr.msk.f32.mxu0 %vm1066_vm0, %v1067_v5  ;;  %995 = vset.pattern.permute.xlu1 %v1070_v11 }
  0x40   : > { %620 = vperm.xlu1 %995, %v1171_v12  }
  0x42   : > { %868 = vmatmul.mubr.msk.f32.gmra.mrb[12].mxu0 %vm321_vm1, %v285_v26 }
  0x43   : > { %919 = vmatprep.mubr.msk.f32.mxu0 %vm1066_vm0, %v1067_v5 }
  0xa0   : > { %v289_v28 = vpop.permute.xlu0 %288  ;;  %v299_v36 = vpop.permute.xlu1 %298 }
  0xa4   : > { %v294_v32 = vpop.permute.xlu0 %293  ;;  %v304_v43 = vpop.permute.xlu1 %303 }
  0xa8   : > { %v309_v52 = vpop.permute.xlu0 %308  ;;  %v314_v54 = vpop.permute.xlu1 %313 }
  0xac   : > { %v319_v60 = vpop.permute.xlu0 %318 }
  0xad   : > { %v459_v13 = vpop.permute.xlu1 %458 }
  0xb1   : > { %v463_v16 = vpop.permute.xlu0 %462 }
  0xb2   : > { %v467_v21 = vpop.permute.xlu1 %466 }
  0xfd   : > { %v409_v29 = vpop.f32.mrb[0].mxu0 }
  0xfe   : > { %v851_v30 = vpop.f32.mrb[1].mxu0  ;;  %v410_v31 = vadd.f32 %v409_v29, %v289_v28  ;;  %v471_v28 = vpop.permute.xlu1 %470 }
 0x100   : > { %v443_v37 = vmax.f32 %v410_v31, 0.0 }
 0x101   : > { %v414_v33 = vpop.f32.mrb[2].mxu0 }
 0x102   : > { %v415_v34 = vadd.f32 %v414_v33, %v294_v32  ;;  %v854_v35 = vpop.f32.mrb[3].mxu0 }
 0x104   : > { %v444_v38 = vmax.f32 %v415_v34, 0.0 }
 0x105   : > { %v419_v39 = vpop.f32.mrb[4].mxu0 }
 0x106   : > { %v857_v40 = vpop.f32.mrb[5].mxu0  ;;  %v929_v41 = vpack.c.bf16 %v444_v38, %v443_v37  ;;  %v420_v42 = vadd.f32 %v419_v39, %v299_v36  ;;  %v475_v36 = vpop.permute.xlu0 %474 }
 0x107   : > { %v479_v38 = vpop.permute.xlu1 %478 }
 0x108   : > { %930 = vmatpush3.bf16.msra.mxu1 %v929_v41  ;;  %v445_v47 = vmax.f32 %v420_v42, 0.0 }
 0x109   : > { %v424_v44 = vpop.f32.mrb[6].mxu0  ;;  %931 = vmatprep.subr.bf16.mxu1 %v1065_v4 }
 0x10a   : > { %v425_v45 = vadd.f32 %v424_v44, %v304_v43  ;;  %v860_v46 = vpop.f32.mrb[7].mxu0  ;;  %v483_v44 = vpop.permute.xlu0 %482 }
 0x10c   : > { %v446_v48 = vmax.f32 %v425_v45, 0.0 }
 0x10d   : > { %v429_v49 = vpop.f32.mrb[8].mxu0 }
 0x10e   : > { %v932_v50 = vpack.c.bf16 %v446_v48, %v445_v47  ;;  %v863_v51 = vpop.f32.mrb[9].mxu0  ;;  %v430_v53 = vadd.f32 %v429_v49, %v309_v52 }
 0x110   : > { %933 = vmatpush3.bf16.msra.mxu1 %v932_v50  ;;  %v447_v58 = vmax.f32 %v430_v53, 0.0  ;;  %v618_v50 = vld [vmem:[%s1343_s3] sm:$0x1] }
 0x111   : > { %v434_v55 = vpop.f32.mrb[10].mxu0  ;;  %934 = vmatprep.subr.bf16.mxu1 %v1065_v4 }
 0x112   : > { %v435_v56 = vadd.f32 %v434_v55, %v314_v54  ;;  %v866_v57 = vpop.f32.mrb[11].mxu0 }
 0x114   : > { %v448_v59 = vmax.f32 %v435_v56, 0.0 }
 0x115   : > { %v439_v61 = vpop.f32.mrb[12].mxu0 }
 0x116   : > { %v935_v62 = vpack.c.bf16 %v448_v59, %v447_v58  ;;  %v440_v63 = vadd.f32 %v439_v61, %v319_v60  ;;  %v869_v0 = vpop.f32.mrb[13].mxu0 }
 0x118   : > { %936 = vmatpush3.bf16.msra.mxu1 %v935_v62  ;;  %v449_v1 = vmax.f32 %v440_v63, 0.0 }
 0x119   : > { %882 = vmatprep.subr.mxu1 %v1067_v5 }
 0x11c   : > { %883 = vmatpush3.msk.msra.mxu1 %vm507_vm2, %v449_v1 }
 0x11d   : > { %885 = vmatmul.mubr.msk.f32.vlgmr.msra.gmra.mrb[0].mxu1 %vm485_vm3, %v450_v2 }
 0x11e   : > { %887 = vmatprep.mubr.msk.f32.mxu1 %vm1066_vm0, %v1067_v5 }
 0x121   : > { %888 = vmatmul.mubr.msk.f32.gmra.mrb[2].mxu1 %vm485_vm3, %v451_v3 }
 0x122   : > { %890 = vmatprep.mubr.msk.f32.mxu1 %vm1066_vm0, %v1067_v5 }
 0x125   : > { %891 = vmatmul.mubr.msk.f32.gmra.mrb[4].mxu1 %vm485_vm3, %v452_v6 }
 0x126   : > { %893 = vmatprep.mubr.msk.f32.mxu1 %vm1066_vm0, %v1067_v5 }
 0x129   : > { %894 = vmatmul.mubr.msk.f32.gmra.mrb[6].mxu1 %vm485_vm3, %v453_v7 }
 0x12a   : > { %896 = vmatprep.mubr.msk.f32.mxu1 %vm1066_vm0, %v1067_v5 }
 0x12d   : > { %897 = vmatmul.mubr.msk.f32.gmra.mrb[8].mxu1 %vm485_vm3, %v454_v8 }
 0x12e   : > { %899 = vmatprep.mubr.msk.f32.mxu1 %vm1066_vm0, %v1067_v5 }
 0x131   : > { %900 = vmatmul.mubr.msk.f32.gmra.mrb[10].mxu1 %vm485_vm3, %v455_v9 }
 0x132   : > { %902 = vmatprep.mubr.msk.f32.mxu1 %vm1066_vm0, %v1067_v5 }
 0x135   : > { %903 = vmatmul.mubr.msk.f32.gmra.mrb[12].mxu1 %vm485_vm3, %v456_v10 }
 0x1f0   : > { %v577_v14 = vpop.f32.mrb[0].mxu1 }
 0x1f1   : > { %v886_v15 = vpop.f32.mrb[1].mxu1  ;;  %v578_v17 = vadd.f32 %v577_v14, %v459_v13 }
 0x1f3   : > { %v611_v22 = vmax.f32 %v578_v17, 0.0 }
 0x1f4   : > { %v582_v18 = vpop.f32.mrb[2].mxu1 }
 0x1f5   : > { %v583_v19 = vadd.f32 %v582_v18, %v463_v16  ;;  %v889_v20 = vpop.f32.mrb[3].mxu1 }
 0x1f7   : > { %v612_v23 = vmax.f32 %v583_v19, 0.0 }
 0x1f8   : > { %v587_v24 = vpop.f32.mrb[4].mxu1 }
 0x1f9   : > { %v938_v25 = vpack.c.bf16 %v612_v23, %v611_v22  ;;  %v892_v26 = vpop.f32.mrb[5].mxu1  ;;  %v588_v27 = vadd.f32 %v587_v24, %v467_v21 }
 0x1fb   : > { %939 = vmatpush3.bf16.msra.mxu0 %v938_v25  ;;  %v613_v31 = vmax.f32 %v588_v27, 0.0 }
 0x1fc   : > { %v592_v29 = vpop.f32.mrb[6].mxu1  ;;  %940 = vmatprep.subr.bf16.mxu0 %v1065_v4 }
 0x1fd   : > { %v593_v12 = vadd.f32 %v592_v29, %v471_v28  ;;  %v895_v30 = vpop.f32.mrb[7].mxu1 }
 0x1ff   : > { %v614_v32 = vmax.f32 %v593_v12, 0.0 }
 0x200   : > { %v597_v33 = vpop.f32.mrb[8].mxu1 }
 0x201   : > { %v941_v34 = vpack.c.bf16 %v614_v32, %v613_v31  ;;  %v898_v35 = vpop.f32.mrb[9].mxu1  ;;  %v598_v37 = vadd.f32 %v597_v33, %v475_v36 }
 0x203   : > { %942 = vmatpush3.bf16.msra.mxu0 %v941_v34  ;;  %v615_v42 = vmax.f32 %v598_v37, 0.0 }
 0x204   : > { %v602_v39 = vpop.f32.mrb[10].mxu1  ;;  %943 = vmatprep.subr.bf16.mxu0 %v1065_v4  ;;  %v621_v4 = vpop.permute.xlu1 %620 }
 0x205   : > { %v603_v40 = vadd.f32 %v602_v39, %v479_v38  ;;  %v901_v41 = vpop.f32.mrb[11].mxu1 }
 0x207   : > { %v616_v43 = vmax.f32 %v603_v40, 0.0 }
 0x208   : > { %v607_v45 = vpop.f32.mrb[12].mxu1 }
 0x209   : > { %v944_v46 = vpack.c.bf16 %v616_v43, %v615_v42  ;;  %v608_v47 = vadd.f32 %v607_v45, %v483_v44  ;;  %v904_v48 = vpop.f32.mrb[13].mxu1 }
 0x20b   : > { %945 = vmatpush3.bf16.msra.mxu0 %v944_v46  ;;  %v617_v49 = vmax.f32 %v608_v47, 0.0 }
 0x20c   : > { %917 = vmatprep.subr.mxu0 %v1067_v5 }
 0x20f   : > { %918 = vmatpush3.msk.msra.mxu0 %vm507_vm2, %v617_v49 }
 0x210   : > { %920 = vmatmul.mubr.msk.f32.vlgmr.msra.gmra.mrb[14].mxu0 %vm485_vm3, %v618_v50 }
 0x2e3   : > { %v695_v51 = vpop.f32.mrb[14].mxu0 }
 0x2e4   : > { %v696_v52 = vadd.f32 %v695_v51, %v621_v4  ;;  %v921_v53 = vpop.f32.mrb[15].mxu0 }
 0x2e6   : > { %v804_v54 = vmul.f32 -1.442695, %v696_v52 }
 0x2e8   : > { %997 = vpow2.f32 %v804_v54 }
 0x2f2   : > { %v998_v55 = vpop.eup %997 }
 0x2f3   : > { %v702_v56 = vadd.f32 1.0, %v998_v55 }
 0x2f5   : > { %999 = vrcp.f32 %v702_v56 }
 0x2ff   : > { %v1000_v5 = vpop.eup %999 }
 0x300   : > { %705 = vst [vmem:[%s267_s15] sm:$0x1] %v1000_v5 }
 0x301   : > { %1014 = shalt.err (!%p1011_p5)
}
 0x302   : > { %s1015_s12 = scalar_lea.hbm %s1296_s25, 16  ;;  %s1019_s10 = scalar_lea.hbm %s1345_s5, 32 }
 0x303   : > { %p1016_p7 = scmp.ne.s32.totalorder %s1296_s25, %s1015_s12  ;;  %p1020_p12 = scmp.lt.u32.totalorder %s1296_s25, %s1345_s5 }
 0x304   : > { %p1021_p13 = scmp.lt.u32.totalorder %s1019_s10, %s1015_s12  ;;  %p1023_p1 = scmp.lt.u32.totalorder %s1015_s12, %s1296_s25 }
 0x305   : > { %p1017_p10 = pnand %p1016_p7, %p1140_p6 }
 0x306   : > { %p1022_p0 = por %p1021_p13, %p1020_p12 }
 0x307   : > { %p1018_p11 = pneg %p1017_p10 }
 0x308   : > { %p1024_p2 = por %p1023_p1, %p1022_p0 }
 0x30a   : > { %p1025_p3 = pnand %p1024_p2, %p1018_p11 }
 0x30c   : > { %1028 = shalt.err (!%p1025_p3)
}
 0x30d   : > { %946 = dma.vmem_to_hbm [thread:$0]  (%p1140_p6), %s1298_s16, 16, %s1296_s25, %s707_s26  }
 0x30e PF: > { %s731_s14 = sand.u32 1, %s1051_s18   ;;  %p949_p4 = pnand %p782_p9, %p1144_p8 }
 0x30f   : > { %s732_s15 = scalar_lea.sflag [#allocation4], %s731_s14 }
 0x310   : > { %1046 = dma.done.wait (!%p949_p4), %s732_s15, 16  }
 0x311   : > { %1048 = vsyncadd (!%p949_p4), %s732_s15, 4294967280  ;;  %p15_p5 = scmp.ge.s32.totalorder %s1125_s24, 4   ;;  %s1348_s18 = smov %s1055_s19 }
 0x312   : > { %s1349_s19 = smov %s1059_s20  ;;  %s1350_s20 = smov %s1138_s27 }
 0x313   : > { %s1351_s21 = smov %s1125_s24  ;;  %17 = sbr.rel (!%p15_p5) target bundleno = 3 (0x3), region = 118 }
 0x31a   :  { %736 = vsyncpa [#allocation4], 1 }
 0x31b   :  { %738 = vsyncpa [#allocation4 + $0x1], 1 }

</bundles_post_ra>
